<compile_context>
chip_gen: v7x
topology: tpu7x:2x2x1
jax: 0.10.0
libtpu: 0.0.40
codegen_flags: <defaults>
</compile_context>

<pallas_src>
import math

import jax
import jax.numpy as jnp
from jax import lax
from jax.experimental import pallas as pl
from jax.experimental.pallas import tpu as pltpu

_INV_SQRT2 = 1.0 / math.sqrt(2.0)
_LANE = 128


def _round_up(v, m):
    return ((v + m - 1) // m) * m


def _gelu(x, approx):
    if approx:
        # tanh approximation: transcendental goes to the EUP slot (frees VALU);
        # NOT bit-exact vs. PyTorch's default erf GELU.
        c = 0.7978845608028654  # sqrt(2/pi)
        return 0.5 * x * (1.0 + jnp.tanh(c * (x + 0.044715 * x * x * x)))
    # PyTorch F.gelu default: 0.5 * x * (1 + erf(x / sqrt(2)))
    return 0.5 * x * (1.0 + lax.erf(x * _INV_SQRT2))


# ----------------------------- kernels -------------------------------------

def _make_single_kernel(approx_gelu):
    # Single hidden step: weights fully resident, no scratch, no pl.when.
    def kernel(x_ref, w1_ref, b1_ref, w2_ref, b2_ref, o_ref):
        h = jnp.dot(x_ref[...], w1_ref[...], preferred_element_type=jnp.float32)
        h = _gelu(h + b1_ref[...].astype(jnp.float32), approx_gelu)
        o = jnp.dot(h.astype(w2_ref.dtype), w2_ref[...],
                    preferred_element_type=jnp.float32)
        o_ref[...] = (o + b2_ref[...].astype(jnp.float32)).astype(o_ref.dtype)
    return kernel


def _make_multi_kernel_direct(approx_gelu):
    # Multi hidden step, f32 output: accumulate straight into the resident
    # output block (first step writes, later steps +=; bias folded into step 0).
    def kernel(x_ref, w1_ref, b1_ref, w2_ref, b2_ref, o_ref):
        hi = pl.program_id(1)
        h = jnp.dot(x_ref[...], w1_ref[...], preferred_element_type=jnp.float32)
        h = _gelu(h + b1_ref[...].astype(jnp.float32), approx_gelu)
        p = jnp.dot(h.astype(w2_ref.dtype), w2_ref[...],
                    preferred_element_type=jnp.float32)

        @pl.when(hi == 0)
        def _():
            o_ref[...] = p + b2_ref[...].astype(jnp.float32)

        @pl.when(hi > 0)
        def _():
            o_ref[...] += p
    return kernel


def _make_multi_kernel_scratch(approx_gelu):
    # Multi hidden step, non-f32 output: f32 accumulator scratch; first step
    # writes (no zero-init pass), last step adds bias and casts.
    def kernel(x_ref, w1_ref, b1_ref, w2_ref, b2_ref, o_ref, acc_ref):
        hi = pl.program_id(1)
        h = jnp.dot(x_ref[...], w1_ref[...], preferred_element_type=jnp.float32)
        h = _gelu(h + b1_ref[...].astype(jnp.float32), approx_gelu)
        p = jnp.dot(h.astype(w2_ref.dtype), w2_ref[...],
                    preferred_element_type=jnp.float32)

        @pl.when(hi == 0)
        def _():
            acc_ref[...] = p

        @pl.when(hi > 0)
        def _():
            acc_ref[...] += p

        @pl.when(hi == pl.num_programs(1) - 1)
        def _():
            o_ref[...] = (acc_ref[...]
                          + b2_ref[...].astype(jnp.float32)).astype(o_ref.dtype)
    return kernel


# ------------------------- params / tile selection --------------------------

def prepare_params(w1, b1, w2, b2):
    """One-time lane-dense (128) padding of hidden/out dims.

    Call this once at parameter init/load time, NOT inside the per-step
    forward, so padded-weight HBM copies are not re-materialized every call.

    w1: [input_dim, hidden]   (transposed vs. PyTorch linear1.weight)
    b1: [hidden]
    w2: [hidden, out_dim]     (transposed vs. PyTorch linear2.weight)
    b2: [out_dim]
    """
    input_dim, hidden = w1.shape
    out_dim = w2.shape[1]
    hid_pad = _round_up(hidden, _LANE)
    out_pad = _round_up(out_dim, _LANE)
    # Exact: padded W1 columns / b1 entries feed zero W2 rows (contribute 0);
    # padded W2 columns / b2 entries are sliced off after the kernel.
    w1p = jnp.pad(w1, ((0, 0), (0, hid_pad - hidden)))
    b1p = jnp.pad(b1, (0, hid_pad - hidden)).reshape(1, hid_pad)
    w2p = jnp.pad(w2, ((0, hid_pad - hidden), (0, out_pad - out_dim)))
    b2p = jnp.pad(b2, (0, out_pad - out_dim)).reshape(1, out_pad)
    return {"w1": w1p, "b1": b1p, "w2": w2p, "b2": b2p,
            "input_dim": input_dim, "out_dim": out_dim,
            "hid_pad": hid_pad, "out_pad": out_pad}


def _physical_vmem_bytes():
    try:
        info = pltpu.get_tpu_info()
        v = int(getattr(info, "vmem_capacity_bytes", 0) or 0)
        if v > 0:
            return v
    except Exception:
        pass
    return 64 * 1024 * 1024   # v7x physical; safe on every generation


def _select_tiles(m, k, hid_pad, out_pad, x_bytes, w_bytes, out_bytes,
                  budget, row_align, tm_req):
    """Pick (tm, th, est): largest hidden chunk that keeps everything inside
    the VMEM budget -- so the hidden grid axis collapses to a single step (and
    the weights stay VMEM-resident across all row tiles) whenever possible.
    Shrink the row tile before shrinking the hidden chunk."""
    n128 = hid_pad // _LANE
    th_cands = sorted({_LANE * d for d in range(1, n128 + 1) if n128 % d == 0},
                      reverse=True)

    def est(tm, th):
        e = 2 * (tm * k * x_bytes                        # x tile (double-buffered)
                 + (k * th + th) * w_bytes               # W1 chunk + b1
                 + (th * out_pad + out_pad) * w_bytes    # W2 chunk + b2
                 + tm * out_pad * out_bytes)             # output block
        e += tm * th * 4                                 # f32 hidden intermediate
        if th < hid_pad and out_bytes != 4:
            e += tm * out_pad * 4                        # f32 accumulator scratch
        return e

    # Row tile: sublane-aligned, never bigger than the rows, and >= 2 row
    # tiles whenever M allows so the "parallel" row axis can be split across
    # both TensorCores on dual-core chips (v7x).
    tm_hi = min(_round_up(tm_req, row_align), _round_up(m, row_align))
    if m > row_align:
        tm_hi = min(tm_hi, _round_up(-(-m // 2), row_align))
    tm_hi = max(tm_hi, row_align)

    tm = tm_hi
    while True:
        for th in th_cands:
            if est(tm, th) <= budget:
                return tm, th, est(tm, th)
        if tm <= row_align:
            break
        tm = max(row_align, _round_up(tm // 2, row_align))
    th = th_cands[-1]
    return tm, th, est(tm, th)   # best effort for tiny VMEM budgets


# ------------------------------- forward ------------------------------------

def nonlinear_head_apply(x, params, *, tm=512, approx_gelu=False):
    """Fused NonLinearHead forward using pre-padded params (prepare_params)."""
    orig_shape = x.shape
    input_dim = params["input_dim"]
    assert orig_shape[-1] == input_dim
    out_dim, hid_pad, out_pad = params["out_dim"], params["hid_pad"], params["out_pad"]
    w1p, b1p, w2p, b2p = params["w1"], params["b1"], params["w2"], params["b2"]

    # Free reshape -- no HBM copies of the activations in the forward path.
    # (input_dim is intentionally NOT padded to 128 lanes here: that would
    # require a full per-call HBM copy of x, which costs more than the
    # partially-filled K vregs it would save for small input_dim.)
    x2 = x.reshape(-1, input_dim)
    m = x2.shape[0]

    row_align = 16 if x2.dtype == jnp.bfloat16 else 8
    physical = _physical_vmem_bytes()
    budget = physical * 3 // 4     # ~96 MiB on v5e/v6e (128 MiB), ~48 MiB on v7x (64 MiB)

    x_b = jnp.dtype(x2.dtype).itemsize
    w_b = jnp.dtype(w1p.dtype).itemsize
    o_b = jnp.dtype(x.dtype).itemsize
    tm_eff, th_eff, est = _select_tiles(m, input_dim, hid_pad, out_pad,
                                        x_b, w_b, o_b, budget, row_align, tm)
    n_rows = -(-m // tm_eff)       # ragged tail row tile: Pallas masks OOB stores
    n_h = hid_pad // th_eff

    vmem_limit = int(min(max(est + (4 << 20), 32 << 20), physical * 17 // 20))

    out_shape = jax.ShapeDtypeStruct((m, out_pad), x.dtype)

    if n_h == 1:
        kernel = _make_single_kernel(approx_gelu)
        grid_spec = pltpu.PrefetchScalarGridSpec(
            num_scalar_prefetch=0,
            grid=(n_rows,),
            in_specs=[
                pl.BlockSpec((tm_eff, input_dim), lambda i: (i, 0)),   # x rows
                pl.BlockSpec((input_dim, hid_pad), lambda i: (0, 0)),  # W1 (resident)
                pl.BlockSpec((1, hid_pad), lambda i: (0, 0)),          # b1
                pl.BlockSpec((hid_pad, out_pad), lambda i: (0, 0)),    # W2 (resident)
                pl.BlockSpec((1, out_pad), lambda i: (0, 0)),          # b2
            ],
            out_specs=pl.BlockSpec((tm_eff, out_pad), lambda i: (i, 0)),
        )
        dims = ("parallel",)
    else:
        use_scratch = jnp.dtype(x.dtype) != jnp.dtype(jnp.float32)
        kernel = (_make_multi_kernel_scratch(approx_gelu) if use_scratch
                  else _make_multi_kernel_direct(approx_gelu))
        scratch = ([pltpu.VMEM((tm_eff, out_pad), jnp.float32)]
                   if use_scratch else [])
        grid_spec = pltpu.PrefetchScalarGridSpec(
            num_scalar_prefetch=0,
            grid=(n_rows, n_h),
            in_specs=[
                pl.BlockSpec((tm_eff, input_dim), lambda i, h: (i, 0)),  # x rows
                pl.BlockSpec((input_dim, th_eff), lambda i, h: (0, h)),  # W1 chunk
                pl.BlockSpec((1, th_eff), lambda i, h: (0, h)),          # b1 chunk
                pl.BlockSpec((th_eff, out_pad), lambda i, h: (h, 0)),    # W2 chunk
                pl.BlockSpec((1, out_pad), lambda i, h: (0, 0)),         # b2
            ],
            out_specs=pl.BlockSpec((tm_eff, out_pad), lambda i, h: (i, 0)),
            scratch_shapes=scratch,
        )
        dims = ("parallel", "arbitrary")

    out = pl.pallas_call(
        kernel,
        out_shape=out_shape,
        grid_spec=grid_spec,
        compiler_params=pltpu.CompilerParams(
            dimension_semantics=dims,
            vmem_limit_bytes=vmem_limit),
    )(x2, w1p, b1p, w2p, b2p)

    if out_pad != out_dim:
        out = out[:, :out_dim]
    return out.reshape(orig_shape[:-1] + (out_dim,))


def nonlinear_head(x, w1, b1, w2, b2, *, tm=512, approx_gelu=False):
    """Convenience path (pads weights per call). For a head invoked every
    step, call prepare_params(...) once and reuse via nonlinear_head_apply."""
    return nonlinear_head_apply(x, prepare_params(w1, b1, w2, b2),
                                tm=tm, approx_gelu=approx_gelu)


# ------------------------------ reference -----------------------------------

def init_params(key, input_dim, out_dim, hidden=None, dtype=jnp.float32):
    """Deterministic synthetic params mirroring nn.Linear (stored transposed)."""
    hidden = input_dim if not hidden else hidden
    k1, k2, k3, k4 = jax.random.split(key, 4)
    lim1 = 1.0 / math.sqrt(input_dim)
    lim2 = 1.0 / math.sqrt(hidden)
    w1 = jax.random.uniform(k1, (input_dim, hidden), dtype, -lim1, lim1)
    b1 = jax.random.uniform(k2, (hidden,), dtype, -lim1, lim1)
    w2 = jax.random.uniform(k3, (hidden, out_dim), dtype, -lim2, lim2)
    b2 = jax.random.uniform(k4, (out_dim,), dtype, -lim2, lim2)
    return w1, b1, w2, b2


def reference(x, w1, b1, w2, b2):
    h = x.astype(jnp.float32) @ w1.astype(jnp.float32) + b1.astype(jnp.float32)
    h = _gelu(h, approx=False)
    return (h @ w2.astype(jnp.float32) + b2.astype(jnp.float32)).astype(x.dtype)


if __name__ == "__main__":
    key = jax.random.PRNGKey(0)
    kx, kp = jax.random.split(key)

    batch, seq, input_dim = 2, 8, 32
    hidden, out_dim = 32, 16   # NonLinearHead(input_dim=32, out_dim=16, 'gelu', hidden=32)

    x = jax.random.normal(kx, (batch, seq, input_dim), dtype=jnp.float32)
    w1, b1, w2, b2 = init_params(kp, input_dim, out_dim, hidden)

    # Pad params once (as a real model would at load time), then run the kernel.
    params = prepare_params(w1, b1, w2, b2)
    y = nonlinear_head_apply(x, params)
    y = jax.block_until_ready(y)

    y_ref = reference(x, w1, b1, w2, b2)
    assert y.shape == (batch, seq, out_dim)
    assert jnp.allclose(y, y_ref, atol=1e-5, rtol=1e-5), "mismatch vs reference"

    print("KERNEL_OK")
</pallas_src>

<mosaic_0001>
module attributes {stable_mosaic.version = 11 : i64} {
  func.func @kernel(%arg0: i32, %arg1: memref<8x32xf32, #tpu.memory_space<vmem>>, %arg2: memref<32x128xf32, #tpu.memory_space<vmem>>, %arg3: memref<1x128xf32, #tpu.memory_space<vmem>>, %arg4: memref<128x128xf32, #tpu.memory_space<vmem>>, %arg5: memref<1x128xf32, #tpu.memory_space<vmem>>, %arg6: memref<8x128xf32, #tpu.memory_space<vmem>>) attributes {dimension_semantics = [#tpu.dimension_semantics<parallel>], iteration_bounds = array<i64: 2>, scalar_prefetch = 0 : i64, scratch_operands = 0 : i64, tpu.core_type = #tpu.core_type<tc>, window_params = [{transform_indices = @transform_0, window_bounds = array<i64: 8, 32>}, {pipeline_mode = #tpu.pipeline_mode<synchronous>, transform_indices = @transform_1, window_bounds = array<i64: 32, 128>}, {pipeline_mode = #tpu.pipeline_mode<synchronous>, transform_indices = @transform_2, window_bounds = array<i64: 1, 128>}, {pipeline_mode = #tpu.pipeline_mode<synchronous>, transform_indices = @transform_3, window_bounds = array<i64: 128, 128>}, {pipeline_mode = #tpu.pipeline_mode<synchronous>, transform_indices = @transform_4, window_bounds = array<i64: 1, 128>}, {transform_indices = @transform_5, window_bounds = array<i64: 8, 128>}]} {
    %c0 = arith.constant 0 : index
    %c0_0 = arith.constant 0 : index
    %0 = vector.load %arg1[%c0, %c0_0] : memref<8x32xf32, #tpu.memory_space<vmem>>, vector<8x32xf32>
    %c0_1 = arith.constant 0 : index
    %c0_2 = arith.constant 0 : index
    %1 = vector.load %arg2[%c0_1, %c0_2] : memref<32x128xf32, #tpu.memory_space<vmem>>, vector<32x128xf32>
    %cst = arith.constant dense<0.000000e+00> : vector<8x128xf32>
    %2 = tpu.matmul %0, %1, %cst {dimension_numbers = #tpu.dot_dimension_numbers<[1], [0], [0], [1], [0, 0, 1, 1], [], []>} : vector<8x32xf32>, vector<32x128xf32>, vector<8x128xf32> -> vector<8x128xf32>
    %c0_3 = arith.constant 0 : index
    %c0_4 = arith.constant 0 : index
    %3 = vector.load %arg3[%c0_3, %c0_4] : memref<1x128xf32, #tpu.memory_space<vmem>>, vector<1x128xf32>
    %4 = vector.broadcast %3 : vector<1x128xf32> to vector<8x128xf32>
    %5 = arith.addf %2, %4 : vector<8x128xf32>
    %cst_5 = arith.constant 5.000000e-01 : f32
    %6 = vector.broadcast %cst_5 : f32 to vector<8x128xf32>
    %7 = arith.mulf %6, %5 : vector<8x128xf32>
    %cst_6 = arith.constant 0.707106769 : f32
    %8 = vector.broadcast %cst_6 : f32 to vector<8x128xf32>
    %9 = arith.mulf %5, %8 : vector<8x128xf32>
    %10 = math.erf %9 : vector<8x128xf32>
    %cst_7 = arith.constant 1.000000e+00 : f32
    %11 = vector.broadcast %cst_7 : f32 to vector<8x128xf32>
    %12 = arith.addf %11, %10 : vector<8x128xf32>
    %13 = arith.mulf %7, %12 : vector<8x128xf32>
    %c0_8 = arith.constant 0 : index
    %c0_9 = arith.constant 0 : index
    %14 = vector.load %arg4[%c0_8, %c0_9] : memref<128x128xf32, #tpu.memory_space<vmem>>, vector<128x128xf32>
    %cst_10 = arith.constant dense<0.000000e+00> : vector<8x128xf32>
    %15 = tpu.matmul %13, %14, %cst_10 {dimension_numbers = #tpu.dot_dimension_numbers<[1], [0], [0], [1], [0, 0, 1, 1], [], []>} : vector<8x128xf32>, vector<128x128xf32>, vector<8x128xf32> -> vector<8x128xf32>
    %c0_11 = arith.constant 0 : index
    %c0_12 = arith.constant 0 : index
    %16 = vector.load %arg5[%c0_11, %c0_12] : memref<1x128xf32, #tpu.memory_space<vmem>>, vector<1x128xf32>
    %17 = vector.broadcast %16 : vector<1x128xf32> to vector<8x128xf32>
    %18 = arith.addf %15, %17 : vector<8x128xf32>
    %c0_13 = arith.constant 0 : index
    %c0_14 = arith.constant 0 : index
    %19 = vector.load %arg6[%c0_13, %c0_14] : memref<8x128xf32, #tpu.memory_space<vmem>>, vector<8x128xf32>
    tpu.vector_store %arg6[%c0_13, %c0_14], %18 {strides = array<i32>} : memref<8x128xf32, #tpu.memory_space<vmem>>, vector<8x128xf32>,
    return
  }
  func.func @transform_0(%arg0: i32) -> (i32, i32) {
    %c0_i32 = arith.constant 0 : i32
    %c0_i32_0 = arith.constant 0 : i32
    return %arg0, %c0_i32 : i32, i32
  }
  func.func @transform_1(%arg0: i32) -> (i32, i32) {
    %c0_i32 = arith.constant 0 : i32
    %c0_i32_0 = arith.constant 0 : i32
    %c0_i32_1 = arith.constant 0 : i32
    return %c0_i32, %c0_i32_0 : i32, i32
  }
  func.func @transform_2(%arg0: i32) -> (i32, i32) {
    %c0_i32 = arith.constant 0 : i32
    %c0_i32_0 = arith.constant 0 : i32
    %c0_i32_1 = arith.constant 0 : i32
    return %c0_i32, %c0_i32_0 : i32, i32
  }
  func.func @transform_3(%arg0: i32) -> (i32, i32) {
    %c0_i32 = arith.constant 0 : i32
    %c0_i32_0 = arith.constant 0 : i32
    %c0_i32_1 = arith.constant 0 : i32
    return %c0_i32, %c0_i32_0 : i32, i32
  }
  func.func @transform_4(%arg0: i32) -> (i32, i32) {
    %c0_i32 = arith.constant 0 : i32
    %c0_i32_0 = arith.constant 0 : i32
    %c0_i32_1 = arith.constant 0 : i32
    return %c0_i32, %c0_i32_0 : i32, i32
  }
  func.func @transform_5(%arg0: i32) -> (i32, i32) {
    %c0_i32 = arith.constant 0 : i32
    %c0_i32_0 = arith.constant 0 : i32
    return %arg0, %c0_i32 : i32, i32
  }
}

</mosaic_0001>

<bundles_post_ra>
// kernel: tpu_custom_call.1
= control target key start
LH: loop header
LB: loop body
LE: loop exit
PB: predicated region body
PF: predicated region fallthrough
CT: control target
= control target key end

     0   :  { %10 = vsyncpa [#allocation3], 0  ;;  %s1187_s0 = inlined_call_operand.hbm [shape: f32[16,32], index: 0, kind: input, shape index: {}]   ;;  %s1188_s1 = inlined_call_operand.hbm [shape: f32[32,128], index: 1, kind: input, shape index: {}]   ;;  %s1189_s2 = inlined_call_operand.vmem [shape: f32[1,128], index: 2, kind: input, shape index: {}]   ;;  %s1190_s3 = inlined_call_operand.hbm [shape: f32[128,128], index: 3, kind: input, shape index: {}]   ;;  %s1191_s4 = inlined_call_operand.vmem [shape: f32[1,128], index: 4, kind: input, shape index: {}]   ;;  %s1192_s5 = inlined_call_operand.hbm [shape: f32[16,128], index: 5, kind: output, shape index: {}]  }
   0x1   :  { %12 = vsyncpa [#allocation3 + $0x1], 0 }
   0x2   :  { %13 = vsyncpa [#allocation6], 0 }
   0x3   :  { %14 = vsyncpa [#allocation4], 0 }
   0x4   :  { %16 = vsyncpa [#allocation4 + $0x1], 0  ;;  %s945_s18 = smov 0   ;;  %s947_s19 = smov 0  }
   0x5   :  { %s949_s20 = smov 0   ;;  %s951_s21 = smov 0  }
   0x6 LB: > { %s966_s22 = sadd.s32 4294967295, %s904_s21   ;;  %s557_s23 = sadd.s32 4294967294, %s904_s21   ;;  %s904_s21 = sphi %s951_s21, %s1212_s21   ;;  %s900_s20 = sphi %s949_s20, %s1211_s20   ;;  %s896_s19 = sphi %s947_s19, %s1210_s19   ;;  %s892_s18 = sphi %s945_s18, %s1209_s18  }
   0x7   : > { %p42_p0 = scmp.ne.s32.totalorder %s896_s19, %s892_s18  ;;  %p1193_p1 = scmp.eq.s32.totalorder %s966_s22, 0 }
   0x8   : > { %p156_p3 = scmp.eq.s32.totalorder %s557_s23, 1  ;;  %p558_p5 = scmp.ge.s32.totalorder %s904_s21, 1 }
   0x9   : > { %p975_p4 = por %p1193_p1, %p42_p0  ;;  %p163_p7 = scmp.lt.s32.totalorder %s904_s21, 3 }
   0xa   : > { %p980_p6 = por %p156_p3, %p42_p0  ;;  %s906_s27 = smov [#allocation5]  }
   0xb   : > { %s1196_s24 = scalar_select %p975_p4, 1, 0 }
   0xc   : > { %s1197_s25 = scalar_select %p980_p6, 1, 0 }
   0xd   : > { %p985_p8 = pnand %p558_p5, %p163_p7  ;;  %s175_s28 = sshll.u32 %s906_s27, 4  ;;  %s989_s28 = int_to_ptr.vmem [resolvable:$true] %s175_s28 }
   0xe   : > { %s907_s30 = smov [#allocation7]   ;;  %s748_s9 = scalar_lea.hbm %s1188_s1, 512 }
   0xf   : > { %p686_p9 = pneg %p985_p8  ;;  %s191_s6 = sshll.u32 %s907_s30, 4  ;;  %s1000_s6 = int_to_ptr.vmem [resolvable:$true] %s191_s6 }
  0x10   : > { %p749_p12 = scmp.ne.s32.totalorder %s1188_s1, %s748_s9  ;;  %p755_p5 = scmp.lt.u32.totalorder %s748_s9, %s1188_s1 }
  0x11   : > { %p996_p11 = pnand %p686_p9, %p1193_p1 }
  0x13   : > { %p750_p13 = pneg %p996_p11 }
  0x15   : > { %p751_p0 = pnand %p750_p13, %p749_p12 }
  0x17   : > { %p752_p3 = pneg %p751_p0 }
  0x19   : > { %p757_p7 = pnand %p755_p5, %p752_p3 }
  0x1b   : > { %760 = shalt.err (!%p757_p7)
}
  0x1c   : > { %s761_s14 = scalar_lea.vmem %s989_s28, 512  ;;  %p769_p2 = scmp.lt.s32.totalorder %s989_s28, %s989_s28 }
  0x1d   : > { %p762_p9 = scmp.ne.s32.totalorder %s989_s28, %s761_s14  ;;  %p770_p12 = scmp.lt.s32.totalorder %s761_s14, %s761_s14 }
  0x1f   : > { %p764_p10 = pnand %p762_p9, %p750_p13  ;;  %p771_p0 = por %p770_p12, %p769_p2 }
  0x21   : > { %p765_p1 = pneg %p764_p10 }
  0x23   : > { %p772_p6 = pnand %p771_p0, %p765_p1 }
  0x25   : > { %775 = shalt.err (!%p772_p6)
}
  0x26   : > { %s908_s15 = smov 128   ;;  %s909_s16 = smov 8  }
  0x27   : > { %689 = dma.hbm_to_vmem [thread:$0]  (!%p996_p11), %s1188_s1, 512, %s989_s28, [#allocation6], %s908_s15, %s908_s15, %s909_s16  }
  0x28   : > { %s776_s7 = scalar_lea.hbm %s1190_s3, 2048 }
  0x29   : > { %p777_p2 = scmp.ne.s32.totalorder %s1190_s3, %s776_s7  ;;  %p783_p10 = scmp.lt.u32.totalorder %s776_s7, %s1190_s3 }
  0x2b   : > { %p779_p1 = pnand %p777_p2, %p750_p13 }
  0x2d   : > { %p780_p6 = pneg %p779_p1 }
  0x2f   : > { %p785_p3 = pnand %p783_p10, %p780_p6 }
  0x31   : > { %788 = shalt.err (!%p785_p3)
}
  0x32   : > { %s789_s28 = scalar_lea.vmem %s1000_s6, 2048  ;;  %p797_p12 = scmp.lt.s32.totalorder %s1000_s6, %s1000_s6 }
  0x33   : > { %p790_p5 = scmp.ne.s32.totalorder %s1000_s6, %s789_s28  ;;  %p798_p0 = scmp.lt.s32.totalorder %s789_s28, %s789_s28 }
  0x35   : > { %p792_p7 = pnand %p790_p5, %p750_p13  ;;  %p799_p2 = por %p798_p0, %p797_p12 }
  0x37   : > { %p793_p9 = pneg %p792_p7 }
  0x39   : > { %p800_p1 = pnand %p799_p2, %p793_p9 }
  0x3b   : > { %803 = shalt.err (!%p800_p1)
}
  0x3c   : > { %692 = dma.hbm_to_vmem [thread:$0]  (!%p996_p11), %s1190_s3, 2048, %s1000_s6, [#allocation6], %s908_s15, %s908_s15, %s909_s16  }
  0x3d   : > { %s1055_s14 = sadd.s32 1, %s904_s21   ;;  %s29_s29 = sadd.s32 1, %s900_s20 }
  0x3e   : > { %s26_s17 = ssub.s32 %s904_s21, %s1055_s14  ;;  %p36_p13 = scmp.ne.s32.totalorder %s900_s20, %s896_s19 }
  0x3f   : > { %p27_p6 = scmp.eq.s32.totalorder %s26_s17, 0  ;;  %p37_p10 = scmp.eq.s32.totalorder %s904_s21, 0 }
  0x40   : > { %p1200_p3 = scmp.eq.s32.totalorder %s966_s22, 1  ;;  %p703_p7 = scmp.lt.s32.totalorder %s904_s21, 2 }
  0x41   : > { %s1071_s27 = scalar_select %p27_p6, %s900_s20, %s29_s29  }
  0x42   : > { %p1065_p5 = por %p1200_p3, %p36_p13  ;;  %p38_p9 = por %p37_p10, %p36_p13 }
  0x43   : > { %s208_s30 = sand.u32 1, %s900_s20   ;;  %s563_s6 = sshll.u32 %s904_s21, 7 }
  0x44   : > { %s1201_s23 = scalar_select %p1065_p5, 1, 0 }
  0x45   : > { %s562_s7 = sshll.u32 %s208_s30, 3  ;;  %s1078_s8 = scalar_lea.hbm %s1187_s0, %s563_s6 }
  0x46   : > { %s212_s9 = scalar_lea.vmem [#allocation2], %s562_s7  ;;  %p1082_p11 = pnand %p703_p7, %p38_p9 }
  0x47   : > { %s219_s10 = sshll.u32 %s212_s9, 4  ;;  %s209_s28 = scalar_lea.sflag [#allocation3], %s208_s30  ;;  %s1080_s10 = int_to_ptr.vmem [resolvable:$true] %s219_s10 }
  0x48   : > { %s804_s12 = scalar_lea.hbm %s1078_s8, 128  ;;  %p806_p0 = pneg %p1082_p11 }
  0x49   : > { %p805_p12 = scmp.ne.s32.totalorder %s1078_s8, %s804_s12  ;;  %s809_s17 = scalar_lea.hbm %s1187_s0, 256 }
  0x4a   : > { %p810_p13 = scmp.lt.u32.totalorder %s1078_s8, %s1187_s0  ;;  %p811_p6 = scmp.lt.u32.totalorder %s809_s17, %s804_s12 }
  0x4b   : > { %p807_p2 = pnand %p806_p0, %p805_p12  ;;  %p813_p3 = scmp.lt.u32.totalorder %s804_s12, %s1078_s8 }
  0x4c   : > { %p812_p10 = por %p811_p6, %p810_p13 }
  0x4d   : > { %p808_p1 = pneg %p807_p2 }
  0x4e   : > { %p814_p7 = por %p813_p3, %p812_p10 }
  0x50   : > { %p815_p9 = pnand %p814_p7, %p808_p1 }
  0x52   : > { %818 = shalt.err (!%p815_p9)
}
  0x53   : > { %s819_s30 = scalar_lea.vmem %s1080_s10, 128  ;;  %s910_s15 = smov [#allocation2]  }
  0x54   : > { %p820_p12 = scmp.ne.s32.totalorder %s1080_s10, %s819_s30  ;;  %s824_s16 = sshll.u32 %s910_s15, 4  ;;  %s825_s16 = int_to_ptr.vmem [resolvable:$false] %s824_s16 }
  0x55   : > { %s826_s9 = scalar_lea.vmem %s825_s16, 256  ;;  %p827_p4 = scmp.lt.s32.totalorder %s1080_s10, %s825_s16 }
  0x56   : > { %p822_p2 = pnand %p820_p12, %p806_p0  ;;  %p828_p13 = scmp.lt.s32.totalorder %s826_s9, %s819_s30 }
  0x58   : > { %p823_p5 = pneg %p822_p2  ;;  %p829_p6 = por %p828_p13, %p827_p4 }
  0x5a   : > { %p830_p10 = pnand %p829_p6, %p823_p5 }
  0x5c   : > { %833 = shalt.err (!%p830_p10)
}
  0x5d   : > { %696 = dma.hbm_to_vmem [thread:$0]  (!%p1082_p11), %s1078_s8, 128, %s1080_s10, %s209_s28  }
  0x5e   : > { %228 = sbr.rel (%p985_p8) target bundleno = 574 (0x23e), region = 40  ;;  %s1114_s12 = sand.u32 (!%p985_p8), 1, %s896_s19  }
  0x5f   : > { %s565_s13 = sshll.u32 (!%p985_p8), %s1114_s12, 3  ;;  %s231_s29 = scalar_lea.sflag (!%p985_p8), [#allocation3], %s1114_s12 }
  0x60   : > { %s1120_s17 = scalar_lea.vmem (!%p985_p8), [#allocation2], %s565_s13  ;;  %p1203_p4 = scmp.ne.s32.totalorder (!%p985_p8), %s1196_s24, 0 }
  0x65   : > { %879 = dma.done.wait (%p1203_p4), %s231_s29, 128  }
  0x66   : > { %881 = vsyncadd (%p1203_p4), %s231_s29, 4294967168  ;;  %p1204_p5 = scmp.eq.s32.totalorder %s966_s22, 0 }
  0x68   : > { %883 = dma.done.wait (%p1204_p5), [#allocation6], 2560   ;;  %p1205_p8 = pmov %p1204_p5 }
  0x69   : > { %v911_v0 = vmov 0.0|0.0   ;;  %vm912_vm0 = vmmov 0   ;;  %v913_v1 = vmov 0.0   ;;  %v270_v2 = vld [vmem:[#allocation5] sm:$0xff]  ;;  %v271_v3 = vld [vmem:[#allocation5 + $0x8] sm:$0xff]  ;;  %v272_v4 = vld [vmem:[#allocation5 + $0x10] sm:$0xff] }
  0x6a   : > { %885 = vsyncadd (%p1205_p8), [#allocation6], 4294964736  ;;  %644 = vmatprep.subr.bf16.mxu0 %v911_v0  ;;  %606 = vmatprep.mubr.msk.f32.mxu0 %vm912_vm0, %v913_v1  ;;  %v645_v5 = vpack.c.bf16 %v271_v3, %v270_v2  ;;  %v273_v6 = vld [vmem:[#allocation5 + $0x18] sm:$0xff]  ;;  %v360_v7 = vld [vmem:[#allocation7] sm:$0xff]  ;;  %vm281_vm1 = vcmask 261120   ;;  %s573_s11 = sshll.u32 %s966_s22, 7 }
  0x6b   : > { %650 = vmatprep.subr.bf16.mxu1 %v911_v0  ;;  %641 = vmatprep.mubr.msk.f32.mxu1 %vm912_vm0, %v913_v1  ;;  %v361_v8 = vld [vmem:[#allocation7 + $0x8] sm:$0xff]  ;;  %v362_v9 = vld [vmem:[#allocation7 + $0x10] sm:$0xff]  ;;  %v363_v10 = vld [vmem:[#allocation7 + $0x18] sm:$0xff]  ;;  %v648_v11 = vpack.c.bf16 %v273_v6, %v272_v4  ;;  %s268_s28 = scalar_lea.vmem [#allocation8], %s565_s13  ;;  %s1143_s15 = scalar_lea.hbm %s1192_s5, %s573_s11 }
  0x6c   : > { %646 = vmatpush3.bf16.msra.mxu0 %v645_v5  ;;  %v651_v12 = vpack.c.bf16 %v361_v8, %v360_v7  ;;  %v654_v13 = vpack.c.bf16 %v363_v10, %v362_v9  ;;  %v364_v14 = vld [vmem:[#allocation7 + $0x20] sm:$0xff]  ;;  %v365_v15 = vld [vmem:[#allocation7 + $0x28] sm:$0xff]  ;;  %v269_v16 = vld [vmem:[%s1120_s17] sm:$0xff]  ;;  %s468_s7 = sshll.u32 %s268_s28, 4  ;;  %s455_s16 = scalar_lea.sflag [#allocation4], %s1114_s12  ;;  %s1145_s7 = int_to_ptr.vmem [resolvable:$true] %s468_s7 }
  0x6d   : > { %647 = vmatprep.subr.bf16.mxu0 %v911_v0  ;;  %v657_v17 = vpack.c.bf16 %v365_v15, %v364_v14  ;;  %v366_v18 = vld [vmem:[#allocation7 + $0x30] sm:$0xff]  ;;  %v367_v19 = vld [vmem:[#allocation7 + $0x38] sm:$0xff]  ;;  %v368_v21 = vld [vmem:[#allocation7 + $0x40] sm:$0xff]  ;;  %s834_s9 = scalar_lea.vmem %s1145_s7, 128  ;;  %p1206_p0 = scmp.ne.s32.totalorder %s1201_s23, 0 }
  0x6e   : > { %652 = vmatpush3.bf16.msra.mxu1 %v651_v12  ;;  %v660_v20 = vpack.c.bf16 %v367_v19, %v366_v18  ;;  %v369_v22 = vld [vmem:[#allocation7 + $0x48] sm:$0xff]  ;;  %v370_v24 = vld [vmem:[#allocation7 + $0x50] sm:$0xff]  ;;  %v371_v25 = vld [vmem:[#allocation7 + $0x58] sm:$0xff]  ;;  %p835_p11 = scmp.ne.s32.totalorder %s1145_s7, %s834_s9  ;;  %s914_s22 = smov [#allocation8]  }
  0x6f   : > { %653 = vmatprep.subr.bf16.mxu1 %v911_v0  ;;  %v663_v23 = vpack.c.bf16 %v369_v22, %v368_v21  ;;  %v666_v26 = vpack.c.bf16 %v371_v25, %v370_v24  ;;  %v372_v27 = vld [vmem:[#allocation7 + $0x60] sm:$0xff]  ;;  %v373_v28 = vld [vmem:[#allocation7 + $0x68] sm:$0xff]  ;;  %v374_v30 = vld [vmem:[#allocation7 + $0x70] sm:$0xff]  ;;  %s838_s13 = sshll.u32 %s914_s22, 4  ;;  %s839_s13 = int_to_ptr.vmem [resolvable:$false] %s838_s13 }
  0x70   : > { %649 = vmatpush3.bf16.msra.mxu0 %v648_v11  ;;  %v669_v29 = vpack.c.bf16 %v373_v28, %v372_v27  ;;  %v375_v31 = vld [vmem:[#allocation7 + $0x78] sm:$0xff]  ;;  %v569_v33 = vld [vmem:[%s1189_s2] ss:$0 sm:$0xff]  ;;  %p836_p1 = pnand %p835_p11, %p1206_p0  ;;  %s840_s29 = scalar_lea.vmem %s839_s13, 256 }
  0x71   : > { %v672_v32 = vpack.c.bf16 %v375_v31, %v374_v30  ;;  %v571_v42 = vld [vmem:[%s1191_s4] ss:$0 sm:$0xff]  ;;  %p841_p7 = scmp.lt.s32.totalorder %s1145_s7, %s839_s13  ;;  %p842_p9 = scmp.lt.s32.totalorder %s840_s29, %s834_s9 }
  0x72   : > { %655 = vmatpush3.bf16.msra.mxu1 %v654_v13  ;;  %p837_p3 = pneg %p836_p1 }
  0x73   : > { %607 = vmatmul.mubr.msk.f32.vlgmr.msra.gmra.mrb[0].mxu0 %vm281_vm1, %v269_v16  ;;  %656 = vmatprep.subr.bf16.mxu1 %v911_v0  ;;  %p843_p12 = por %p842_p9, %p841_p7 }
  0x75   : > { %p844_p2 = pnand %p843_p12, %p837_p3 }
  0x76   : > { %658 = vmatpush3.bf16.msra.mxu1 %v657_v17 }
  0x77   : > { %659 = vmatprep.subr.bf16.mxu1 %v911_v0 }
  0x7a   : > { %661 = vmatpush3.bf16.msra.mxu1 %v660_v20 }
  0x7b   : > { %662 = vmatprep.subr.bf16.mxu1 %v911_v0 }
  0x7e   : > { %664 = vmatpush3.bf16.msra.mxu1 %v663_v23 }
  0x7f   : > { %665 = vmatprep.subr.bf16.mxu1 %v911_v0 }
  0x82   : > { %667 = vmatpush3.bf16.msra.mxu1 %v666_v26 }
  0x83   : > { %668 = vmatprep.subr.bf16.mxu1 %v911_v0 }
  0x86   : > { %670 = vmatpush3.bf16.msra.mxu1 %v669_v29 }
  0x87   : > { %671 = vmatprep.subr.bf16.mxu1 %v911_v0 }
  0x8a   : > { %673 = vmatpush3.bf16.msra.mxu1 %v672_v32 }
 0x146   : > { %v351_v34 = vpop.f32.mrb[0].mxu0 }
 0x147   : > { %v352_v35 = vadd.f32 %v569_v33, %v351_v34  ;;  %v608_v36 = vpop.f32.mrb[1].mxu0 }
 0x149   : > { %v356_v37 = vmul.f32 0.70710677, %v352_v35  ;;  %v355_v39 = vmul.f32 0.5, %v352_v35 }
 0x14b   : > { %746 = verf.f32 %v356_v37 }
 0x155   : > { %v747_v38 = vpop.eup %746 }
 0x156   : > { %v358_v40 = vadd.f32 1.0, %v747_v38 }
 0x158   : > { %v359_v41 = vmul.f32 %v358_v40, %v355_v39 }
 0x15a   : > { %642 = vmatmul.mubr.f32.vlgmr.msra.gmra.mrb[0].mxu1 %v359_v41 }
 0x22d   : > { %v449_v43 = vpop.f32.mrb[0].mxu1 }
 0x22e   : > { %v450_v44 = vadd.f32 %v571_v42, %v449_v43  ;;  %v643_v45 = vpop.f32.mrb[1].mxu1 }
 0x230   : > { %453 = vst [vmem:[%s268_s28] sm:$0xff] %v450_v44 }
 0x231   : > { %847 = shalt.err (!%p844_p2)
}
 0x232   : > { %s848_s12 = scalar_lea.hbm %s1143_s15, 128  ;;  %s852_s26 = scalar_lea.hbm %s1192_s5, 256 }
 0x233   : > { %p849_p13 = scmp.ne.s32.totalorder %s1143_s15, %s848_s12  ;;  %p853_p4 = scmp.lt.u32.totalorder %s1143_s15, %s1192_s5 }
 0x234   : > { %p854_p5 = scmp.lt.u32.totalorder %s852_s26, %s848_s12  ;;  %p856_p11 = scmp.lt.u32.totalorder %s848_s12, %s1143_s15 }
 0x235   : > { %p850_p6 = pnand %p849_p13, %p1206_p0 }
 0x236   : > { %p855_p8 = por %p854_p5, %p853_p4 }
 0x237   : > { %p851_p10 = pneg %p850_p6 }
 0x238   : > { %p857_p1 = por %p856_p11, %p855_p8 }
 0x23a   : > { %p858_p3 = pnand %p857_p1, %p851_p10 }
 0x23c   : > { %861 = shalt.err (!%p858_p3)
}
 0x23d   : > { %684 = dma.vmem_to_hbm [thread:$0]  (%p1206_p0), %s1145_s7, 128, %s1143_s15, %s455_s16  }
 0x23e PF: > { %s480_s11 = sand.u32 1, %s892_s18   ;;  %p1207_p7 = scmp.ne.s32.totalorder %s1197_s25, 0 }
 0x23f   : > { %p1208_p9 = scmp.ge.s32.totalorder %s904_s21, 2  ;;  %s481_s28 = scalar_lea.sflag [#allocation4], %s480_s11 }
 0x241   : > { %p698_p12 = pnand %p1208_p9, %p1207_p7 }
 0x243   : > { %887 = dma.done.wait (!%p698_p12), %s481_s28, 128  }
 0x244   : > { %889 = vsyncadd (!%p698_p12), %s481_s28, 4294967168  ;;  %p19_p2 = scmp.ge.s32.totalorder %s1055_s14, 4   ;;  %s1209_s18 = smov %s896_s19 }
 0x245   : > { %s1210_s19 = smov %s900_s20  ;;  %s1211_s20 = smov %s1071_s27 }
 0x246   : > { %s1212_s21 = smov %s1055_s14  ;;  %21 = sbr.rel (!%p19_p2) target bundleno = 6 (0x6), region = 93 }
 0x24d   :  { %486 = vsyncpa [#allocation3], 1 }
 0x24e   :  { %488 = vsyncpa [#allocation3 + $0x1], 1 }
 0x24f   :  { %489 = vsyncpa [#allocation6], 1 }
 0x250   :  { %490 = vsyncpa [#allocation4], 1 }
 0x251   :  { %492 = vsyncpa [#allocation4 + $0x1], 1 }

</bundles_post_ra>
